<compile_context>
chip_gen: v5e
topology: v5e:2x2
jax: 0.10.0
libtpu: 0.0.40
codegen_flags: <defaults>
</compile_context>

<pallas_src>
import functools

import jax
import jax.numpy as jnp
from jax.experimental import pallas as pl
from jax.experimental.pallas import tpu as pltpu


# --------------------------------------------------------------------------- #
# Pallas kernel: per-(batch-row, neuron) Pearson correlation over time,
# computed single-pass from sufficient statistics.
# --------------------------------------------------------------------------- #
def _corr_kernel(out_ref, tgt_ref, corr_ref, *, lag, t_out, eps):
    # out_ref: (BB, T_out, TILE_N); tgt_ref: (BB, T_tgt, TILE_N);
    # corr_ref: (BB, 1, TILE_N).
    o = out_ref[...].astype(jnp.float32)                       # (BB, T_out, TILE_N)
    # Static lag window.  When lag % 8 == 0 this is a sublane-aligned (cheap)
    # slice; otherwise Mosaic realigns the tile once per step (XLU work).
    # TODO(synk): when lag is a large fraction of T_tgt, skip DMAing the first
    # `lag` target rows entirely (memory_space=pl.ANY + make_async_copy with an
    # element offset) -- direct HBM-bandwidth saving proportional to lag/T_tgt.
    t = tgt_ref[:, pl.ds(lag, t_out), :].astype(jnp.float32)   # (BB, T_out, TILE_N)

    inv_t = 1.0 / float(t_out)
    s_o = jnp.sum(o, axis=1)            # (BB, TILE_N)
    s_t = jnp.sum(t, axis=1)
    s_oo = jnp.sum(o * o, axis=1)
    s_tt = jnp.sum(t * t, axis=1)
    s_ot = jnp.sum(o * t, axis=1)

    m_o = s_o * inv_t
    m_t = s_t * inv_t
    cov = s_ot * inv_t - m_o * m_t
    var_o = s_oo * inv_t - m_o * m_o
    var_t = s_tt * inv_t - m_t * m_t

    # rsqrt lowers to the EUP (its own bundle slot, off the VALU critical path).
    corr = cov * jax.lax.rsqrt((var_o + eps) * (var_t + eps))  # (BB, TILE_N)
    corr_ref[...] = corr[:, None, :]


# --------------------------------------------------------------------------- #
# Block / tile selection.
# --------------------------------------------------------------------------- #
def _vmem_capacity_bytes():
    try:
        return int(pltpu.get_tpu_info().vmem_capacity_bytes)
    except Exception:
        return 64 * 1024 * 1024     # conservative fallback (v7x per-TC VMEM)


def _choose_blocks(B, N, t_out, t_tgt, out_itemsize, tgt_itemsize,
                   tile_n=None, batch_block=None):
    cap = _vmem_capacity_bytes()
    budget = min(32 * 1024 * 1024, cap // 2)          # footprint budget for tiles
    vmem_limit = min(40 * 1024 * 1024, int(cap * 0.65))  # compiler VMEM limit

    # Per lane, per batch row, per grid step:
    #   double-buffered inputs: 2 * (T_out*sz_o + T_tgt*sz_t)
    #   f32 up-cast / product temporaries (single-pass): ~4 * T_out * 4
    #   f32 output, double buffered: 2 * 4
    per_lane_per_row = (2 * (t_out * out_itemsize + t_tgt * tgt_itemsize)
                        + 4 * t_out * 4 + 8)

    # Lane tile: biggest that fits the budget at BB=1 (multiple of 128, or full N).
    if tile_n is None:
        max_lanes = max(128, (budget // per_lane_per_row) // 128 * 128)
        tile_n = N if N <= max_lanes else max_lanes
    tile_n = int(min(tile_n, N))
    if tile_n < N:
        tile_n = max(128, tile_n // 128 * 128)   # last-dim blocks must be %128

    # Batch block: target ~1.5 MiB of input bytes per grid step (hides the
    # ~0.35 us fixed per-step overhead), capped by B and by the VMEM budget.
    if batch_block is None:
        row_in_bytes = tile_n * (t_out * out_itemsize + t_tgt * tgt_itemsize)
        batch_block = max(1, min(B, int((3 * 1024 * 1024 // 2) // max(row_in_bytes, 1))))
        while batch_block > 1 and batch_block * tile_n * per_lane_per_row > budget:
            batch_block -= 1
        # Keep >= 2 grid steps when possible: v7x megacore sharding + pipelining.
        n_steps = pl.cdiv(N, tile_n) * pl.cdiv(B, batch_block)
        if n_steps < 2 and B >= 2:
            batch_block = pl.cdiv(B, 2)
    batch_block = int(max(1, min(batch_block, B)))
    return tile_n, batch_block, int(vmem_limit)


# --------------------------------------------------------------------------- #
# pallas_call wrapper: per-(batch, neuron) correlation, returns (B, 1, N) f32.
# --------------------------------------------------------------------------- #
def _pearson_corr_pallas(output, target, *, eps, tile_n=None, batch_block=None):
    B, T_out, N = output.shape
    T_tgt = target.shape[1]
    lag = T_tgt - T_out

    tile_n, bb, vmem_limit = _choose_blocks(
        B, N, T_out, T_tgt, output.dtype.itemsize, target.dtype.itemsize,
        tile_n=tile_n, batch_block=batch_block)

    kernel = functools.partial(_corr_kernel, lag=lag, t_out=T_out, eps=eps)

    cost = pl.CostEstimate(
        flops=int(8 * B * T_out * N),
        transcendentals=int(B * N),
        bytes_accessed=int(B * N * (T_out * output.dtype.itemsize
                                    + T_tgt * target.dtype.itemsize)
                           + B * N * 4),
    )

    return pl.pallas_call(
        kernel,
        out_shape=jax.ShapeDtypeStruct((B, 1, N), jnp.float32),
        grid=(pl.cdiv(B, bb), pl.cdiv(N, tile_n)),
        in_specs=[
            pl.BlockSpec((bb, T_out, tile_n), lambda b, n: (b, 0, n)),
            pl.BlockSpec((bb, T_tgt, tile_n), lambda b, n: (b, 0, n)),
        ],
        out_specs=pl.BlockSpec((bb, 1, tile_n), lambda b, n: (b, 0, n)),
        compiler_params=pltpu.CompilerParams(
            dimension_semantics=("parallel", "parallel"),
            vmem_limit_bytes=vmem_limit,
        ),
        cost_estimate=cost,
    )(output, target)


# --------------------------------------------------------------------------- #
# Loss wrapper (cheap glue in plain JAX, semantics identical to the torch code).
# --------------------------------------------------------------------------- #
def celltype_correlation_loss_3d(output, target, group_assignment, group_counts,
                                 *, eps=1e-16, per_neuron=False, avg=False,
                                 tile_n=None, batch_block=None):
    """Faithful port of CelltypeCorrelationLoss3d.forward.

    output:           (B, T_out, N)
    target:           (B, T_target, N), T_target >= T_out
    group_assignment: (N,) int, values in 1..G (1-indexed, as in the torch code)
    group_counts:     (G,)
    """
    corrs = _pearson_corr_pallas(output, target, eps=eps, tile_n=tile_n,
                                 batch_block=batch_block)                 # (B,1,N)

    # Cell-type weighting (same as torch: counts.sum()/G / counts[assign-1]).
    w = (group_counts.sum() / group_counts.shape[0]
         / group_counts[group_assignment - 1]).astype(jnp.float32)        # (N,)

    # torch: corrs (B,1,N) * w[:,None] (N,1) broadcasts to (B,N,N).  That outer
    # product is separable, so the reductions collapse to O(B*N) exactly:
    #   sum  -> corrs.sum() * w.sum()
    #   mean -> corrs.mean() * w.mean()
    #   per_neuron mean over (B*N) rows -> w.mean() * corrs.mean over batch
    if not per_neuron:
        if avg:
            return -(corrs.mean() * w.mean())
        return -(corrs.sum() * w.sum())
    return -(w.mean() * corrs.mean(axis=(0, 1)))                          # (N,)


# --------------------------------------------------------------------------- #
# Pure-JAX transcription of the PyTorch forward (literal broadcast) for checks.
# --------------------------------------------------------------------------- #
def _reference(output, target, group_assignment, group_counts,
               eps=1e-16, per_neuron=False, avg=False):
    lag = target.shape[1] - output.shape[1]
    delta_out = output - output.mean(1, keepdims=True)
    tgt = target[:, lag:, :]
    delta_target = tgt - tgt.mean(1, keepdims=True)
    var_out = (delta_out ** 2).mean(1, keepdims=True)
    var_target = (delta_target ** 2).mean(1, keepdims=True)
    corrs = (delta_out * delta_target).mean(1, keepdims=True) / jnp.sqrt(
        (var_out + eps) * (var_target + eps))
    w = group_counts.sum() / group_counts.shape[0] / group_counts[group_assignment - 1]
    corrs = corrs * w[:, None]          # (B,1,N) * (N,1) -> (B,N,N), as in torch
    if not per_neuron:
        return -corrs.mean() if avg else -corrs.sum()
    return -corrs.reshape(-1, corrs.shape[-1]).mean(axis=0)


if __name__ == "__main__":
    key = jax.random.PRNGKey(0)
    k1, k2, k3, k4 = jax.random.split(key, 4)

    # --- small case (N < 128: lane block covers full N; batch-blocked grid) --
    B, T_out, T_tgt, N, G = 2, 8, 10, 16, 4
    output = jax.random.normal(k1, (B, T_out, N), dtype=jnp.float32)
    target = jax.random.normal(k2, (B, T_tgt, N), dtype=jnp.float32)
    group_assignment = (jnp.arange(N, dtype=jnp.int32) % G) + 1            # (N,)
    group_counts = jnp.bincount(group_assignment - 1, length=G).astype(jnp.float32)

    for kwargs in ({}, {"avg": True}, {"per_neuron": True}):
        got = jax.block_until_ready(
            celltype_correlation_loss_3d(output, target, group_assignment,
                                         group_counts, **kwargs))
        ref = _reference(output, target, group_assignment, group_counts, **kwargs)
        assert jnp.allclose(got, ref, rtol=1e-3, atol=1e-3), (kwargs, got, ref)

    # --- larger case exercising the lane-tiled grid (N multiple of 128) -----
    B2, T2_out, T2_tgt, N2, G2 = 2, 16, 20, 384, 5
    output2 = jax.random.normal(k3, (B2, T2_out, N2), dtype=jnp.float32)
    target2 = jax.random.normal(k4, (B2, T2_tgt, N2), dtype=jnp.float32)
    ga2 = (jnp.arange(N2, dtype=jnp.int32) % G2) + 1
    gc2 = jnp.bincount(ga2 - 1, length=G2).astype(jnp.float32)

    got2 = jax.block_until_ready(
        celltype_correlation_loss_3d(output2, target2, ga2, gc2, tile_n=128))
    ref2 = _reference(output2, target2, ga2, gc2)
    assert jnp.abs(got2 - ref2) / (jnp.abs(ref2) + 1.0) < 1e-3, (got2, ref2)

    got2_pn = jax.block_until_ready(
        celltype_correlation_loss_3d(output2, target2, ga2, gc2,
                                     per_neuron=True, tile_n=128))
    ref2_pn = _reference(output2, target2, ga2, gc2, per_neuron=True)
    assert jnp.allclose(got2_pn, ref2_pn, rtol=1e-3, atol=1e-3)

    # --- default auto-tiling path (no overrides) -----------------------------
    got3 = jax.block_until_ready(
        celltype_correlation_loss_3d(output2, target2, ga2, gc2, avg=True))
    ref3 = _reference(output2, target2, ga2, gc2, avg=True)
    assert jnp.allclose(got3, ref3, rtol=1e-3, atol=1e-3), (got3, ref3)

    print("KERNEL_OK")
</pallas_src>

<mosaic_0001>
module attributes {stable_mosaic.version = 11 : i64} {
  func.func @_corr_kernel(%arg0: i32, %arg1: i32, %arg2: memref<1x8x16xf32, #tpu.memory_space<vmem>>, %arg3: memref<1x10x16xf32, #tpu.memory_space<vmem>>, %arg4: memref<1x1x16xf32, #tpu.memory_space<vmem>>) attributes {dimension_semantics = [#tpu.dimension_semantics<parallel>, #tpu.dimension_semantics<parallel>], iteration_bounds = array<i64: 2, 1>, scalar_prefetch = 0 : i64, scratch_operands = 0 : i64, tpu.core_type = #tpu.core_type<tc>, window_params = [{transform_indices = @transform_0, window_bounds = array<i64: 1, 8, 16>}, {transform_indices = @transform_1, window_bounds = array<i64: 1, 10, 16>}, {transform_indices = @transform_2, window_bounds = array<i64: 1, 1, 16>}]} {
    %c0 = arith.constant 0 : index
    %c0_0 = arith.constant 0 : index
    %c0_1 = arith.constant 0 : index
    %0 = vector.load %arg2[%c0, %c0_0, %c0_1] : memref<1x8x16xf32, #tpu.memory_space<vmem>>, vector<1x8x16xf32>
    %c0_2 = arith.constant 0 : index
    %c2 = arith.constant 2 : index
    %c0_3 = arith.constant 0 : index
    %1 = vector.load %arg3[%c0_2, %c2, %c0_3] : memref<1x10x16xf32, #tpu.memory_space<vmem>>, vector<1x8x16xf32>
    %cst = arith.constant dense<0.000000e+00> : vector<1x16xf32>
    %2 = vector.multi_reduction <add>, %0, %cst [1] : vector<1x8x16xf32> to vector<1x16xf32>
    %cst_4 = arith.constant dense<0.000000e+00> : vector<1x16xf32>
    %3 = vector.multi_reduction <add>, %1, %cst_4 [1] : vector<1x8x16xf32> to vector<1x16xf32>
    %4 = arith.mulf %0, %0 : vector<1x8x16xf32>
    %cst_5 = arith.constant dense<0.000000e+00> : vector<1x16xf32>
    %5 = vector.multi_reduction <add>, %4, %cst_5 [1] : vector<1x8x16xf32> to vector<1x16xf32>
    %6 = arith.mulf %1, %1 : vector<1x8x16xf32>
    %cst_6 = arith.constant dense<0.000000e+00> : vector<1x16xf32>
    %7 = vector.multi_reduction <add>, %6, %cst_6 [1] : vector<1x8x16xf32> to vector<1x16xf32>
    %8 = arith.mulf %0, %1 : vector<1x8x16xf32>
    %cst_7 = arith.constant dense<0.000000e+00> : vector<1x16xf32>
    %9 = vector.multi_reduction <add>, %8, %cst_7 [1] : vector<1x8x16xf32> to vector<1x16xf32>
    %cst_8 = arith.constant 1.250000e-01 : f32
    %10 = vector.broadcast %cst_8 : f32 to vector<1x16xf32>
    %11 = arith.mulf %2, %10 : vector<1x16xf32>
    %cst_9 = arith.constant 1.250000e-01 : f32
    %12 = vector.broadcast %cst_9 : f32 to vector<1x16xf32>
    %13 = arith.mulf %3, %12 : vector<1x16xf32>
    %cst_10 = arith.constant 1.250000e-01 : f32
    %14 = vector.broadcast %cst_10 : f32 to vector<1x16xf32>
    %15 = arith.mulf %9, %14 : vector<1x16xf32>
    %16 = arith.mulf %11, %13 : vector<1x16xf32>
    %17 = arith.subf %15, %16 : vector<1x16xf32>
    %cst_11 = arith.constant 1.250000e-01 : f32
    %18 = vector.broadcast %cst_11 : f32 to vector<1x16xf32>
    %19 = arith.mulf %5, %18 : vector<1x16xf32>
    %20 = arith.mulf %11, %11 : vector<1x16xf32>
    %21 = arith.subf %19, %20 : vector<1x16xf32>
    %cst_12 = arith.constant 1.250000e-01 : f32
    %22 = vector.broadcast %cst_12 : f32 to vector<1x16xf32>
    %23 = arith.mulf %7, %22 : vector<1x16xf32>
    %24 = arith.mulf %13, %13 : vector<1x16xf32>
    %25 = arith.subf %23, %24 : vector<1x16xf32>
    %cst_13 = arith.constant 1.000000e-16 : f32
    %26 = vector.broadcast %cst_13 : f32 to vector<1x16xf32>
    %27 = arith.addf %21, %26 : vector<1x16xf32>
    %cst_14 = arith.constant 1.000000e-16 : f32
    %28 = vector.broadcast %cst_14 : f32 to vector<1x16xf32>
    %29 = arith.addf %25, %28 : vector<1x16xf32>
    %30 = arith.mulf %27, %29 : vector<1x16xf32>
    %31 = math.rsqrt %30 : vector<1x16xf32>
    %32 = arith.mulf %17, %31 : vector<1x16xf32>
    %33 = vector.shape_cast %32 : vector<1x16xf32> to vector<1x1x16xf32>
    %c0_15 = arith.constant 0 : index
    %c0_16 = arith.constant 0 : index
    %c0_17 = arith.constant 0 : index
    %34 = vector.load %arg4[%c0_15, %c0_16, %c0_17] : memref<1x1x16xf32, #tpu.memory_space<vmem>>, vector<1x1x16xf32>
    tpu.vector_store %arg4[%c0_15, %c0_16, %c0_17], %33 {strides = array<i32>} : memref<1x1x16xf32, #tpu.memory_space<vmem>>, vector<1x1x16xf32>,
    return
  }
  func.func @transform_0(%arg0: i32, %arg1: i32) -> (i32, i32, i32) {
    %c0_i32 = arith.constant 0 : i32
    %c0_i32_0 = arith.constant 0 : i32
    return %arg0, %c0_i32, %arg1 : i32, i32, i32
  }
  func.func @transform_1(%arg0: i32, %arg1: i32) -> (i32, i32, i32) {
    %c0_i32 = arith.constant 0 : i32
    %c0_i32_0 = arith.constant 0 : i32
    return %arg0, %c0_i32, %arg1 : i32, i32, i32
  }
  func.func @transform_2(%arg0: i32, %arg1: i32) -> (i32, i32, i32) {
    %c0_i32 = arith.constant 0 : i32
    %c0_i32_0 = arith.constant 0 : i32
    return %arg0, %c0_i32, %arg1 : i32, i32, i32
  }
}

</mosaic_0001>

<bundles_post_ra>
// kernel: tpu_custom_call.1
= control target key start
LH: loop header
LB: loop body
LE: loop exit
PB: predicated region body
PF: predicated region fallthrough
CT: control target
= control target key end

     0   :  { %7 = vsyncpa [#allocation3], 0  ;;  %s629_s0 = inlined_call_operand.vmem [shape: f32[2,8,16], index: 0, kind: input, shape index: {}]   ;;  %s630_s1 = inlined_call_operand.vmem [shape: f32[2,10,16], index: 1, kind: input, shape index: {}]   ;;  %s631_s2 = inlined_call_operand.hbm [shape: f32[2,1,16], index: 2, kind: output, shape index: {}]  }
   0x1   :  { %9 = vsyncpa [#allocation3 + $0x1], 0  ;;  %s524_s9 = smov 0   ;;  %s526_s10 = smov 0  }
   0x2   :  { %s528_s11 = smov 0   ;;  %s530_s12 = smov 0  }
   0x3   :  { %s532_s13 = smov 0   ;;  %s534_s14 = smov 0  }
   0x4 LB: > { %s361_s15 = sadd.s32 4294967295, %s507_s14   ;;  %s362_s16 = sadd.s32 4294967294, %s507_s14   ;;  %s507_s14 = sphi %s534_s14, %s15_s14   ;;  %s503_s13 = sphi %s532_s13, %s638_s13   ;;  %s499_s12 = sphi %s530_s12, %s637_s12   ;;  %s495_s11 = sphi %s528_s11, %s636_s11   ;;  %s491_s10 = sphi %s526_s10, %s635_s10   ;;  %s487_s9 = sphi %s524_s9, %s634_s9  }
   0x5   : > { %s27_s17 = sadd.s32 1, %s503_s13  ;;  %s92_s18 = sadd.s32 1, %s495_s11 }
   0x6   : > { %p29_p0 = scmp.ge.s32.totalorder %s27_s17, 2  ;;  %p102_p1 = scmp.ne.s32.totalorder %s495_s11, %s491_s10 }
   0x7   : > { %p103_p2 = scmp.eq.s32.totalorder %s361_s15, 1  ;;  %p108_p3 = scmp.ne.s32.totalorder %s491_s10, %s487_s9 }
   0x8   : > { %s640_s17 = smov (%p29_p0, %s27_s17), 0  ;;  %p109_p5 = scmp.eq.s32.totalorder %s362_s16, 1 }
   0x9   : > { %p564_p4 = por %p103_p2, %p102_p1  ;;  %s87_s20 = ssub.s32 %s503_s13, %s640_s17 }
   0xa   : > { %p365_p6 = scmp.ge.s32.totalorder %s507_s14, 1  ;;  %p90_p7 = scmp.eq.s32.totalorder %s87_s20, 0 }
   0xb   : > { %p571_p8 = por %p109_p5, %p108_p3  ;;  %p148_p9 = scmp.lt.s32.totalorder %s507_s14, 3 }
   0xc   : > { %s577_s22 = scalar_select %p90_p7, %s495_s11, %s92_s18  }
   0xd   : > { %p149_p10 = pnand %p365_p6, %p148_p9 }
   0xe   : > { %p179_p11 = scmp.lt.s32.totalorder (!%p149_p10), %s499_s12, 1  ;;  %s177_s4 = sand.u32 (!%p149_p10), 1, %s491_s10  }
   0xf   : > { %152 = sbr.rel (%p149_p10) target bundleno = 72 (0x48), region = 28  ;;  %s272_s7 = scalar_lea.hbm (!%p149_p10), %s631_s2, %s499_s12 }
  0x10   : > { %s178_s8 = scalar_lea.vmem (!%p149_p10), [#allocation2], %s177_s4  ;;  %s276_s16 = sshll.u32 (!%p149_p10), %s272_s7, 4  ;;  %s277_s16 = int_to_ptr.hbm [resolvable:$true] %s276_s16 }
  0x11   : > { %s274_s15 = sshll.u32 (!%p149_p10), %s178_s8, 4  ;;  %s263_s18 = scalar_lea.sflag (!%p149_p10), [#allocation3], %s177_s4  ;;  %s275_s15 = int_to_ptr.vmem [resolvable:$true] %s274_s15 }
  0x12   : > { %s443_s20 = sshra.s32 (!%p149_p10), %s277_s16, 4  ;;  %s444_s20 = int_to_ptr.hbm [resolvable:$true] %s443_s20 }
  0x13   : > { %p450_p1 = scmp.lt.s32.totalorder (!%p149_p10), %s444_s20, %s631_s2 }
  0x14   : > { %s180_s23 = scalar_select %p179_p11, %s499_s12, 1  ;;  %vm196_vm0 = vcmask 130048   ;;  %vm260_vm4 = vcmask 122880  }
  0x16   : > { %s366_s24 = sshll.u32 %s180_s23, 3  ;;  %s371_s25 = sshll.u32 %s180_s23, 4 }
  0x17   : > { %s185_s28 = scalar_lea.vmem %s629_s0, %s366_s24  ;;  %s193_s3 = scalar_lea.vmem %s630_s1, %s371_s25 }
  0x18   : > { %v194_v0 = vld [vmem:[%s185_s28] sm:$0xff]  ;;  %s445_s23 = scalar_lea.hbm %s444_s20, 1  ;;  %s449_s25 = scalar_lea.hbm %s631_s2, 2 }
  0x19   : > { %v195_v1 = vld [vmem:[%s193_s3 + $0x2] sm:$0xff]  ;;  %v197_v2 = vsel %vm196_vm0, %v194_v0, 0.0  ;;  %v211_v4 = vmul.f32 %v194_v0, %v194_v0  ;;  %p446_p12 = scmp.ne.s32.totalorder %s444_s20, %s445_s23  ;;  %p451_p2 = scmp.lt.s32.totalorder %s449_s25, %s445_s23 }
  0x1a   : > { %v204_v3 = vsel %vm196_vm0, %v195_v1, 0.0  ;;  %v219_v5 = vmul.f32 %v195_v1, %v195_v1  ;;  %v198_v6 = vrot.slane %v197_v2, 4  ;;  %v227_v10 = vmul.f32 %v195_v1, %v194_v0 }
  0x1b   : > { %v205_v7 = vrot.slane %v204_v3, 4  ;;  %v212_v8 = vsel %vm196_vm0, %v211_v4, 0.0  ;;  %p447_p13 = pnand %p446_p12, %p564_p4  ;;  %p452_p3 = por %p451_p2, %p450_p1 }
  0x1c   : > { %v220_v9 = vsel %vm196_vm0, %v219_v5, 0.0  ;;  %v199_v11 = vadd.f32 %v198_v6, %v197_v2  ;;  %v213_v13 = vrot.slane %v212_v8, 4  ;;  %v228_v19 = vsel %vm196_vm0, %v227_v10, 0.0 }
  0x1d   : > { %v206_v12 = vadd.f32 %v205_v7, %v204_v3  ;;  %v221_v14 = vrot.slane %v220_v9, 4  ;;  %v229_v28 = vrot.slane %v228_v19, 4  ;;  %p448_p0 = pneg %p447_p13 }
  0x1e   : > { %v200_v15 = vrot.slane %v199_v11, 2  ;;  %v214_v17 = vadd.f32 %v213_v13, %v212_v8 }
  0x1f   : > { %v207_v16 = vrot.slane %v206_v12, 2  ;;  %v222_v18 = vadd.f32 %v221_v14, %v220_v9  ;;  %v230_v37 = vadd.f32 %v229_v28, %v228_v19  ;;  %p453_p5 = pnand %p452_p3, %p448_p0 }
  0x20   : > { %v201_v20 = vadd.f32 %v200_v15, %v199_v11  ;;  %v215_v22 = vrot.slane %v214_v17, 2 }
  0x21   : > { %v208_v21 = vadd.f32 %v207_v16, %v206_v12  ;;  %v223_v23 = vrot.slane %v222_v18, 2  ;;  %v231_v43 = vrot.slane %v230_v37, 2 }
  0x22   : > { %v202_v24 = vrot.slane %v201_v20, 1  ;;  %v216_v26 = vadd.f32 %v215_v22, %v214_v17 }
  0x23   : > { %v209_v25 = vrot.slane %v208_v21, 1  ;;  %v224_v27 = vadd.f32 %v223_v23, %v222_v18  ;;  %v232_v47 = vadd.f32 %v231_v43, %v230_v37 }
  0x24   : > { %v203_v29 = vadd.f32 %v202_v24, %v201_v20  ;;  %v217_v31 = vrot.slane %v216_v26, 1 }
  0x25   : > { %v210_v30 = vadd.f32 %v209_v25, %v208_v21  ;;  %v225_v32 = vrot.slane %v224_v27, 1  ;;  %v233_v49 = vrot.slane %v232_v47, 1 }
  0x26   : > { %v218_v33 = vadd.f32 %v217_v31, %v216_v26  ;;  %v235_v35 = vmul.f32 0.125, %v203_v29 }
  0x27   : > { %v226_v34 = vadd.f32 %v225_v32, %v224_v27  ;;  %v236_v36 = vmul.f32 0.125, %v210_v30  ;;  %v234_v51 = vadd.f32 %v233_v49, %v232_v47 }
  0x28   : > { %v240_v38 = vmul.f32 0.125, %v218_v33  ;;  %v241_v39 = vmul.f32 %v235_v35, %v235_v35 }
  0x29   : > { %v243_v40 = vmul.f32 0.125, %v226_v34  ;;  %v244_v41 = vmul.f32 %v236_v36, %v236_v36  ;;  %v237_v54 = vmul.f32 0.125, %v234_v51  ;;  %v238_v55 = vmul.f32 %v236_v36, %v235_v35 }
  0x2a   : > { %v242_v42 = vsub.f32 %v240_v38, %v241_v39 }
  0x2b   : > { %v245_v44 = vsub.f32 %v243_v40, %v244_v41  ;;  %v239_v58 = vsub.f32 %v237_v54, %v238_v55 }
  0x2c   : > { %v246_v45 = vadd.f32 1e-16, %v242_v42 }
  0x2d   : > { %v247_v46 = vadd.f32 1e-16, %v245_v44 }
  0x2f   : > { %v248_v48 = vmul.f32 %v247_v46, %v246_v45 }
  0x31   : > { %427 = vrsqrt.f32 %v248_v48  ;;  %vm255_vm1 = vweird.f32 %v248_v48 }
  0x37   : > { %v428_v50 = vpop.eup %427 }
  0x38   : > { %v250_v52 = vmul.f32 %v428_v50, %v248_v48  ;;  %vm256_vm2 = vweird.f32 %v428_v50 }
  0x39   : > { %vm257_vm3 = vmor %vm255_vm1, %vm256_vm2 }
  0x3a   : > { %v251_v53 = vmul.f32 %v428_v50, %v250_v52 }
  0x3c   : > { %v252_v56 = vmul.f32 0.5, %v251_v53 }
  0x3e   : > { %v253_v57 = vsub.f32 1.5, %v252_v56 }
  0x40   : > { %v254_v59 = vmul.f32 %v428_v50, %v253_v57 }
  0x42   : > { %v258_v60 = vsel %vm257_vm3, %v428_v50, %v254_v59 }
  0x43   : > { %v259_v61 = vmul.f32 %v258_v60, %v239_v58 }
  0x45   : > { %261 = vst.msk [vmem:[%s178_s8] sm:$0x1] %vm260_vm4, %v259_v61 }
  0x46   : > { %456 = shalt.err (!%p453_p5)
}
  0x47   : > { %372 = dma.vmem_to_hbm [thread:$0]  (%p564_p4), %s275_s15, 16, %s277_s16, %s263_s18  }
  0x48 PF: > { %p378_p6 = scmp.ge.s32.totalorder %s507_s14, 2  ;;  %s288_s28 = sand.u32 1, %s487_s9  }
  0x49   : > { %s289_s29 = scalar_lea.sflag [#allocation3], %s288_s28 }
  0x4a   : > { %p375_p7 = pnand %p378_p6, %p571_p8 }
  0x4c   : > { %p376_p9 = pneg %p375_p7 }
  0x4e   : > { %482 = dma.done.wait (%p376_p9), %s289_s29, 16  }
  0x4f   : > { %484 = vsyncadd (%p376_p9), %s289_s29, 4294967280  ;;  %s15_s14 = sadd.s32 1, %s507_s14   ;;  %s634_s9 = smov %s491_s10 }
  0x50   : > { %p12_p10 = scmp.ge.s32.totalorder %s15_s14, 4   ;;  %s635_s10 = smov %s495_s11 }
  0x51   : > { %s636_s11 = smov %s577_s22  ;;  %s637_s12 = smov %s503_s13 }
  0x52   : > { %s638_s13 = smov %s640_s17  ;;  %14 = sbr.rel (!%p12_p10) target bundleno = 4 (0x4), region = 66 }
  0x57   :  { %294 = vsyncpa [#allocation3], 1 }
  0x58   :  { %296 = vsyncpa [#allocation3 + $0x1], 1 }

</bundles_post_ra>
